<compile_context>
chip_gen: v6e
topology: v6e:2x2x1
jax: 0.10.0
libtpu: 0.0.40
codegen_flags: <defaults>
</compile_context>

<pallas_src>
import functools

import jax
import jax.numpy as jnp
from jax.experimental import pallas as pl
from jax.experimental.pallas import tpu as pltpu


# ----------------------------- Pallas kernel ------------------------------- #
def _label_embed_kernel(ids_ref, drop_ref, table_ref, w_ref, b_ref, o_ref, *, null_id):
    """Fused: one-hot gather (MXU) + Linear projection (MXU), single block.

    ids_ref   : VMEM (B, 1) int32   raw labels
    drop_ref  : VMEM (B, 1) int32   force-drop flags (CFG)
    table_ref : VMEM (R, D) float32 text-feature table (R = padded rows)
    w_ref     : VMEM (D, H) float32 transposed nn.Linear weight
    b_ref     : VMEM (1, H) float32
    o_ref     : VMEM (B, H) float32
    """
    B, H = o_ref.shape
    R, D = table_ref.shape

    # CFG label dropout fused in-kernel (replaces the wrapper-side XLA select).
    ids = ids_ref[...]                                         # (B, 1)
    drop = drop_ref[...]                                       # (B, 1)
    resolved = jnp.where(drop != 0, jnp.int32(null_id), ids)   # (B, 1)

    # One-hot gather on the otherwise-idle MXU: (B, R) @ (R, D) -> (B, D).
    # No scalar-dependent addressing, no partial stores; ids outside [0, R)
    # yield an all-zero row instead of an OOB VMEM read.
    col = jax.lax.broadcasted_iota(jnp.int32, (B, R), 1)
    one_hot = (col == resolved).astype(table_ref.dtype)        # (B, R) f32
    x = jnp.dot(one_hot, table_ref[...], preferred_element_type=jnp.float32)

    # Projection (matches PyTorch nn.Linear in f32): (B, D) @ (D, H) + bias.
    o_ref[...] = (
        jnp.dot(x, w_ref[...], preferred_element_type=jnp.float32) + b_ref[...]
    )


def label_embed_pallas(ids, drop, table, w_t, bias, *, null_id):
    """ids/drop: (B,) int32; table: (R, D) f32; w_t: (D, H) f32; bias: (H,) f32."""
    B = ids.shape[0]
    R, D = table.shape
    D2, H = w_t.shape
    assert D == D2

    ids2 = ids.reshape(B, 1).astype(jnp.int32)
    drop2 = drop.reshape(B, 1).astype(jnp.int32)
    bias2 = bias.reshape(1, H)

    flops = 2 * B * R * D + 2 * B * D * H
    bytes_accessed = 4 * (ids2.size + drop2.size + table.size + w_t.size
                          + bias2.size + B * H)

    kernel = functools.partial(_label_embed_kernel, null_id=null_id)
    vmem = pltpu.MemorySpace.VMEM
    return pl.pallas_call(
        kernel,
        out_shape=jax.ShapeDtypeStruct((B, H), jnp.float32),
        in_specs=[
            pl.BlockSpec(memory_space=vmem),   # ids
            pl.BlockSpec(memory_space=vmem),   # drop flags
            pl.BlockSpec(memory_space=vmem),   # table
            pl.BlockSpec(memory_space=vmem),   # weight (D, H)
            pl.BlockSpec(memory_space=vmem),   # bias (1, H)
        ],
        out_specs=pl.BlockSpec(memory_space=vmem),
        cost_estimate=pl.CostEstimate(
            flops=flops, transcendentals=0, bytes_accessed=bytes_accessed),
    )(ids2, drop2, table, w_t, bias2)


# ------------------------- LabelEmbedder (JAX side) ------------------------ #
class LabelEmbedderPallas:
    def __init__(self, hidden_size, dropout_prob, *, num_classes=16,
                 encoder_output_dim=256, key=None):
        self.hidden_size = hidden_size
        self.dropout_prob = dropout_prob  # eval mode in the reference -> 0
        self.encoder_output_dim = encoder_output_dim
        self.num_classes = num_classes

        key = jax.random.PRNGKey(0) if key is None else key
        k_tab, k_w, k_b = jax.random.split(key, 3)

        # Stand-in for the frozen CLIP text encoder: one row per class + a
        # trailing "null" row used when a label is dropped (CFG).  Rows padded
        # to a multiple of 8 for clean sublane layout; extra rows never selected
        # by the in-kernel one-hot.
        n_rows = num_classes + 1
        n_rows_padded = ((n_rows + 7) // 8) * 8
        self.text_table = jax.random.normal(
            k_tab, (n_rows_padded, encoder_output_dim), dtype=jnp.float32)

        # nn.Linear(encoder_output_dim, hidden_size): weight (H, D), bias (H,).
        # Kept in f32 (stored transposed for the kernel) to match the PyTorch
        # reference precision exactly.
        bound = 1.0 / (encoder_output_dim ** 0.5)
        w = jax.random.uniform(
            k_w, (hidden_size, encoder_output_dim),
            minval=-bound, maxval=bound, dtype=jnp.float32)
        self.proj_w_t = jnp.transpose(w)                     # (D, H) f32
        self.proj_b = jax.random.uniform(
            k_b, (hidden_size,), minval=-bound, maxval=bound, dtype=jnp.float32)

    # Pure-JAX stand-in for ClipTextEncoder.encode_text (no grad, .float()).
    def encode_text(self, labels, force_drop_ids=None):
        ids = labels.astype(jnp.int32)
        if force_drop_ids is not None:
            ids = jnp.where(force_drop_ids.astype(bool),
                            jnp.int32(self.num_classes), ids)
        return self.text_table[ids]  # (B, D_enc) float32

    def __call__(self, labels, force_drop_ids=None):
        B = labels.shape[0]
        drop = (jnp.zeros((B,), jnp.int32) if force_drop_ids is None
                else force_drop_ids.astype(jnp.int32))
        # Fused (CFG select + gather + Linear projection) in one Pallas kernel.
        return label_embed_pallas(
            labels.astype(jnp.int32), drop, self.text_table,
            self.proj_w_t, self.proj_b, null_id=self.num_classes)


# ---------------------------------- main ----------------------------------- #
if __name__ == "__main__":
    key = jax.random.PRNGKey(0)
    k_labels, k_params = jax.random.split(key)

    B = 8
    hidden_size = 128
    module = LabelEmbedderPallas(
        hidden_size=hidden_size, dropout_prob=0.0,
        num_classes=16, encoder_output_dim=256, key=k_params)

    labels = jax.random.randint(k_labels, (B,), 0, module.num_classes)
    force_drop_ids = (jnp.arange(B) % 4 == 0).astype(jnp.int32)  # drop a few (CFG)

    out = module(labels, force_drop_ids=force_drop_ids)
    out = jax.block_until_ready(out)

    # Reference check in plain JAX, all f32 (mirrors the PyTorch Linear).
    feats = module.encode_text(labels, force_drop_ids)              # (B, D) f32
    ref = jnp.dot(feats, module.proj_w_t,
                  preferred_element_type=jnp.float32) + module.proj_b
    assert out.shape == (B, hidden_size)
    assert out.dtype == jnp.float32
    assert jnp.allclose(out, ref, atol=1e-3, rtol=1e-3)

    # Also verify the force_drop_ids=None path runs.
    out2 = jax.block_until_ready(module(labels))
    feats2 = module.encode_text(labels)
    ref2 = jnp.dot(feats2, module.proj_w_t,
                   preferred_element_type=jnp.float32) + module.proj_b
    assert jnp.allclose(out2, ref2, atol=1e-3, rtol=1e-3)

    print("KERNEL_OK")
</pallas_src>

<mosaic_0001>
module attributes {stable_mosaic.version = 11 : i64} {
  func.func @_label_embed_kernel(%arg0: memref<8x1xi32, #tpu.memory_space<vmem>>, %arg1: memref<8x1xi32, #tpu.memory_space<vmem>>, %arg2: memref<24x256xf32, #tpu.memory_space<vmem>>, %arg3: memref<256x128xf32, #tpu.memory_space<vmem>>, %arg4: memref<1x128xf32, #tpu.memory_space<vmem>>, %arg5: memref<8x128xf32, #tpu.memory_space<vmem>>) attributes {dimension_semantics = [], scalar_prefetch = 0 : i64, scratch_operands = 0 : i64, tpu.core_type = #tpu.core_type<tc>} {
    %c0 = arith.constant 0 : index
    %c0_0 = arith.constant 0 : index
    %0 = vector.load %arg0[%c0, %c0_0] : memref<8x1xi32, #tpu.memory_space<vmem>>, vector<8x1xi32>
    %c0_1 = arith.constant 0 : index
    %c0_2 = arith.constant 0 : index
    %1 = vector.load %arg1[%c0_1, %c0_2] : memref<8x1xi32, #tpu.memory_space<vmem>>, vector<8x1xi32>
    %c0_i32 = arith.constant 0 : i32
    %2 = vector.broadcast %c0_i32 : i32 to vector<8x1xi32>
    %3 = arith.cmpi ne, %1, %2 : vector<8x1xi32>
    %c16_i32 = arith.constant 16 : i32
    %4 = vector.broadcast %c16_i32 : i32 to vector<8x1xi32>
    %5 = arith.select %3, %4, %0 : vector<8x1xi1>, vector<8x1xi32>
    %6 = tpu.iota {dimensions = array<i32: 1>} : vector<8x24xi32>
    %7 = vector.broadcast %5 : vector<8x1xi32> to vector<8x24xi32>
    %8 = arith.cmpi eq, %6, %7 : vector<8x24xi32>
    %9 = arith.extui %8 : vector<8x24xi1> to vector<8x24xi32>
    %10 = arith.sitofp %9 : vector<8x24xi32> to vector<8x24xf32>
    %c0_3 = arith.constant 0 : index
    %c0_4 = arith.constant 0 : index
    %11 = vector.load %arg2[%c0_3, %c0_4] : memref<24x256xf32, #tpu.memory_space<vmem>>, vector<24x256xf32>
    %cst = arith.constant dense<0.000000e+00> : vector<8x256xf32>
    %12 = tpu.matmul %10, %11, %cst {dimension_numbers = #tpu.dot_dimension_numbers<[1], [0], [0], [1], [0, 0, 1, 1], [], []>} : vector<8x24xf32>, vector<24x256xf32>, vector<8x256xf32> -> vector<8x256xf32>
    %c0_5 = arith.constant 0 : index
    %c0_6 = arith.constant 0 : index
    %13 = vector.load %arg3[%c0_5, %c0_6] : memref<256x128xf32, #tpu.memory_space<vmem>>, vector<256x128xf32>
    %cst_7 = arith.constant dense<0.000000e+00> : vector<8x128xf32>
    %14 = tpu.matmul %12, %13, %cst_7 {dimension_numbers = #tpu.dot_dimension_numbers<[1], [0], [0], [1], [0, 0, 1, 1], [], []>} : vector<8x256xf32>, vector<256x128xf32>, vector<8x128xf32> -> vector<8x128xf32>
    %c0_8 = arith.constant 0 : index
    %c0_9 = arith.constant 0 : index
    %15 = vector.load %arg4[%c0_8, %c0_9] : memref<1x128xf32, #tpu.memory_space<vmem>>, vector<1x128xf32>
    %16 = vector.broadcast %15 : vector<1x128xf32> to vector<8x128xf32>
    %17 = arith.addf %14, %16 : vector<8x128xf32>
    %c0_10 = arith.constant 0 : index
    %c0_11 = arith.constant 0 : index
    %18 = vector.load %arg5[%c0_10, %c0_11] : memref<8x128xf32, #tpu.memory_space<vmem>>, vector<8x128xf32>
    tpu.vector_store %arg5[%c0_10, %c0_11], %17 {strides = array<i32>} : memref<8x128xf32, #tpu.memory_space<vmem>>, vector<8x128xf32>,
    return
  }
}

</mosaic_0001>

<bundles_post_ra>
// kernel: tpu_custom_call.1
= control target key start
LH: loop header
LB: loop body
LE: loop exit
PB: predicated region body
PF: predicated region fallthrough
CT: control target
= control target key end

     0   :  { %10 = vsyncpa [#allocation3], 0  ;;  %s441_s0 = inlined_call_operand.vmem [shape: s32[8,1], index: 0, kind: input, shape index: {}]   ;;  %s442_s1 = inlined_call_operand.vmem [shape: s32[8,1], index: 1, kind: input, shape index: {}]   ;;  %s443_s2 = inlined_call_operand.hbm [shape: f32[24,256], index: 2, kind: input, shape index: {}]   ;;  %s444_s3 = inlined_call_operand.hbm [shape: f32[256,128], index: 3, kind: input, shape index: {}]   ;;  %s445_s4 = inlined_call_operand.vmem [shape: f32[1,128], index: 4, kind: input, shape index: {}]   ;;  %s446_s5 = inlined_call_operand.hbm [shape: f32[8,128], index: 5, kind: output, shape index: {}]  }
   0x1   :  { %11 = vsyncpa [#allocation6], 0 }
   0x2   :  { %12 = vsyncpa [#allocation4], 0  ;;  %s382_s18 = smov [#allocation2]  }
   0x3   :  { %s22_s19 = sshll.u32 %s382_s18, 4  ;;  %s23_s19 = int_to_ptr.vmem [resolvable:$true] %s22_s19 }
   0x4   :  { %s324_s20 = scalar_lea.vmem %s23_s19, 768  ;;  %p329_p1 = scmp.lt.s32.totalorder %s23_s19, %s23_s19 }
   0x5   :  { %p325_p0 = scmp.ne.s32.totalorder %s23_s19, %s324_s20  ;;  %p330_p2 = scmp.lt.s32.totalorder %s324_s20, %s324_s20 }
   0x7   :  { %p331_p3 = por %p330_p2, %p329_p1 }
   0x9   :  { %p332_p4 = pnand %p331_p3, %p325_p0 }
   0xb   :  { %335 = shalt.err (!%p332_p4)
}
   0xc   :  { %s383_s21 = smov 256   ;;  %s384_s22 = smov 16  }
   0xd   :  { %28 = dma.hbm_to_vmem [thread:$0]  %s443_s2, 768, %s23_s19, [#allocation3], %s383_s21, %s383_s21, %s384_s22  }
   0xe   :  { %s385_s25 = smov [#allocation5]  }
   0xf   :  { %s34_s26 = sshll.u32 %s385_s25, 4  ;;  %s35_s26 = int_to_ptr.vmem [resolvable:$true] %s34_s26 }
  0x10   :  { %s344_s27 = scalar_lea.vmem %s35_s26, 4096  ;;  %p349_p6 = scmp.lt.s32.totalorder %s35_s26, %s35_s26 }
  0x11   :  { %p345_p5 = scmp.ne.s32.totalorder %s35_s26, %s344_s27  ;;  %p350_p7 = scmp.lt.s32.totalorder %s344_s27, %s344_s27 }
  0x13   :  { %p351_p8 = por %p350_p7, %p349_p6 }
  0x15   :  { %p352_p9 = pnand %p351_p8, %p345_p5 }
  0x17   :  { %355 = shalt.err (!%p352_p9)
}
  0x18   :  { %s386_s28 = smov 128   ;;  %s387_s29 = smov 8  }
  0x19   :  { %40 = dma.hbm_to_vmem [thread:$0]  %s444_s3, 4096, %s35_s26, [#allocation6], %s386_s28, %s386_s28, %s387_s29  }
  0x1a   :  { %376 = dma.done.wait [#allocation3], 768  }
  0x1b   :  { %377 = vsyncadd [#allocation3], 4294966528 }
  0x1c   :  { %378 = dma.done.wait [#allocation6], 4096  }
  0x1d   :  { %379 = vsyncadd [#allocation6], 4294963200  ;;  %v388_v0 = vmov 0   ;;  %v49_v1 = vld [vmem:[%s441_s0] sm:$0xff]  ;;  %v66_v3 = vld [vmem:[#allocation2 + $0x28] sm:$0xff]  ;;  %v389_v4 = vmov 0.0   ;;  %v53_v39 = vlaneseq }
  0x1e   :  { %315 = vset.pattern.permute.xlu0 %v388_v0  ;;  %v50_v2 = vld [vmem:[%s442_s1] sm:$0xff]  ;;  %135 = vmatprep.mubr.f32.mxu0 %v389_v4  ;;  %v64_v6 = vld [vmem:[#allocation2 + $0x18] sm:$0xff]  ;;  %v63_v7 = vld [vmem:[#allocation2 + $0x10] sm:$0xff]  ;;  %vm67_vm1 = vcmask 195584   ;;  %s390_s3 = smov [#allocation7]  }
  0x1f   :  { %vm51_vm0 = vcmp.ne.s32.totalorder %v50_v2, 0  ;;  %97 = vmatprep.subr.mxu0 %v66_v3  ;;  %v65_v5 = vld [vmem:[#allocation2 + $0x20] sm:$0xff]  ;;  %v62_v9 = vld [vmem:[#allocation2 + $0x8] sm:$0xff]  ;;  %v171_v15 = vld [vmem:[#allocation5 + $0xe8] sm:$0xff]  ;;  %v54_v40 = vand.u32 127, %v53_v39  ;;  %s258_s10 = sshll.u32 %s390_s3, 4  ;;  %s259_s10 = int_to_ptr.vmem [resolvable:$true] %s258_s10 }
  0x20   :  { %v52_v8 = vsel %vm51_vm0, 16, %v49_v1  ;;  %98 = vmatpush1.msra.mxu0 %v65_v5  ;;  %v173_v10 = vld [vmem:[#allocation5 + $0xf8] sm:$0xff]  ;;  %v61_v11 = vld [vmem:[#allocation2] sm:$0xff]  ;;  %v155_v16 = vld [vmem:[#allocation5 + $0x68] sm:$0xff]  ;;  %s356_s11 = scalar_lea.vmem %s259_s10, 128  ;;  %p361_p11 = scmp.lt.s32.totalorder %s259_s10, %s259_s10 }
  0x21   :  { %56 = vperm.xlu0 %315, %v52_v8   ;;  %99 = vmatprep.subr.mxu0 %v64_v6  ;;  %v157_v12 = vld [vmem:[#allocation5 + $0x78] sm:$0xff]  ;;  %v172_v13 = vld [vmem:[#allocation5 + $0xf0] sm:$0xff]  ;;  %v170_v17 = vld [vmem:[#allocation5 + $0xe0] sm:$0xff]  ;;  %p357_p10 = scmp.ne.s32.totalorder %s259_s10, %s356_s11  ;;  %p362_p12 = scmp.lt.s32.totalorder %s356_s11, %s356_s11 }
  0x22   :  { %100 = vmatpush1.msra.mxu0 %v63_v7  ;;  %271 = vmatprep.subr.mxu1 %v173_v10  ;;  %v156_v14 = vld [vmem:[#allocation5 + $0x70] sm:$0xff]  ;;  %v154_v18 = vld [vmem:[#allocation5 + $0x60] sm:$0xff]  ;;  %v169_v19 = vld [vmem:[#allocation5 + $0xd8] sm:$0xff] }
  0x23   :  { %101 = vmatprep.subr.mxu0 %v62_v9  ;;  %272 = vmatpush3.msra.mxu1 %v157_v12  ;;  %v153_v20 = vld [vmem:[#allocation5 + $0x58] sm:$0xff]  ;;  %v168_v21 = vld [vmem:[#allocation5 + $0xd0] sm:$0xff]  ;;  %v167_v23 = vld [vmem:[#allocation5 + $0xc8] sm:$0xff]  ;;  %p363_p13 = por %p362_p12, %p361_p11 }
  0x24   :  { %102 = vmatpush1.msra.mxu0 %v61_v11  ;;  %273 = vmatprep.subr.mxu1 %v172_v13  ;;  %v152_v22 = vld [vmem:[#allocation5 + $0x50] sm:$0xff]  ;;  %v151_v24 = vld [vmem:[#allocation5 + $0x48] sm:$0xff]  ;;  %v166_v25 = vld [vmem:[#allocation5 + $0xc0] sm:$0xff] }
  0x25   :  { %274 = vmatpush3.msra.mxu1 %v156_v14  ;;  %v150_v26 = vld [vmem:[#allocation5 + $0x40] sm:$0xff]  ;;  %v165_v27 = vld [vmem:[#allocation5 + $0xb8] sm:$0xff]  ;;  %v164_v29 = vld [vmem:[#allocation5 + $0xb0] sm:$0xff]  ;;  %p364_p0 = pnand %p363_p13, %p357_p10 }
  0x26   :  { %275 = vmatprep.subr.mxu1 %v171_v15  ;;  %v149_v28 = vld [vmem:[#allocation5 + $0x38] sm:$0xff]  ;;  %v148_v30 = vld [vmem:[#allocation5 + $0x30] sm:$0xff]  ;;  %v163_v31 = vld [vmem:[#allocation5 + $0xa8] sm:$0xff] }
  0x27   :  { %276 = vmatpush3.msra.mxu1 %v155_v16  ;;  %v147_v32 = vld [vmem:[#allocation5 + $0x28] sm:$0xff]  ;;  %v162_v33 = vld [vmem:[#allocation5 + $0xa0] sm:$0xff]  ;;  %v161_v35 = vld [vmem:[#allocation5 + $0x98] sm:$0xff] }
  0x28   :  { %277 = vmatprep.subr.mxu1 %v170_v17  ;;  %v146_v34 = vld [vmem:[#allocation5 + $0x20] sm:$0xff]  ;;  %v145_v36 = vld [vmem:[#allocation5 + $0x18] sm:$0xff]  ;;  %v160_v37 = vld [vmem:[#allocation5 + $0x90] sm:$0xff] }
  0x29   :  { %278 = vmatpush3.msra.mxu1 %v154_v18  ;;  %v144_v38 = vld [vmem:[#allocation5 + $0x10] sm:$0xff]  ;;  %v159_v43 = vld [vmem:[#allocation5 + $0x88] sm:$0xff]  ;;  %v158_v45 = vld [vmem:[#allocation5 + $0x80] sm:$0xff] }
  0x2a   :  { %279 = vmatprep.subr.mxu1 %v169_v19  ;;  %v143_v44 = vld [vmem:[#allocation5 + $0x8] sm:$0xff]  ;;  %v142_v46 = vld [vmem:[#allocation5] sm:$0xff]  ;;  %v270_v50 = vld [vmem:[%s445_s4] ss:$0 sm:$0xff] }
  0x2b   :  { %280 = vmatpush3.msra.mxu1 %v153_v20 }
  0x2c   :  { %281 = vmatprep.subr.mxu1 %v168_v21 }
  0x2d   :  { %282 = vmatpush3.msra.mxu1 %v152_v22 }
  0x2e   :  { %283 = vmatprep.subr.mxu1 %v167_v23 }
  0x2f   :  { %284 = vmatpush3.msra.mxu1 %v151_v24 }
  0x30   :  { %285 = vmatprep.subr.mxu1 %v166_v25 }
  0x31   :  { %286 = vmatpush3.msra.mxu1 %v150_v26 }
  0x32   :  { %287 = vmatprep.subr.mxu1 %v165_v27 }
  0x33   :  { %288 = vmatpush3.msra.mxu1 %v149_v28 }
  0x34   :  { %289 = vmatprep.subr.mxu1 %v164_v29 }
  0x35   :  { %290 = vmatpush3.msra.mxu1 %v148_v30 }
  0x36   :  { %291 = vmatprep.subr.mxu1 %v163_v31 }
  0x37   :  { %292 = vmatpush3.msra.mxu1 %v147_v32 }
  0x38   :  { %293 = vmatprep.subr.mxu1 %v162_v33 }
  0x39   :  { %294 = vmatpush3.msra.mxu1 %v146_v34 }
  0x3a   :  { %295 = vmatprep.subr.mxu1 %v161_v35 }
  0x3b   :  { %296 = vmatpush3.msra.mxu1 %v145_v36 }
  0x3c   :  { %297 = vmatprep.subr.mxu1 %v160_v37 }
  0x3d   :  { %298 = vmatpush3.msra.mxu1 %v144_v38 }
  0x3e   :  { %299 = vmatprep.subr.mxu1 %v159_v43 }
  0x3f   :  { %300 = vmatpush3.msra.mxu1 %v143_v44 }
  0x40   :  { %301 = vmatprep.subr.mxu1 %v158_v45 }
  0x41   :  { %302 = vmatpush3.msra.mxu1 %v142_v46 }
  0x9c   :  { %v57_v41 = vpop.permute.xlu0 %56 }
  0x9d   :  { %vm58_vm2 = vcmp.eq.s32.totalorder %v54_v40, %v57_v41 }
  0x9e   :  { %v268_v42 = vsel %vm58_vm2, 1.0, %v389_v4 }
  0x9f   :  { %269 = vmatmul.mubr.msk.f32.vlgmr.msra.gmra.mxu0 %vm67_vm1, %v268_v42 }
 0x15f   :  { %v137_v47 = vpop.f32.mrf.mxu0 }
 0x161   :  { %v139_v48 = vpop.f32.mrf.mxu0 }
 0x162   :  { %245 = vmatprep.mubr.f32.mxu1 %v139_v48 }
 0x163   :  { %246 = vmatmul.mubr.f32.vlgmr.msra.gmra.mxu1 %v137_v47 }
 0x223   :  { %v303_v49 = vpop.f32.mrf.mxu1 }
 0x225   :  { %v304_v51 = vpop.f32.mrf.mxu1 }
 0x226   :  { %v305_v52 = vadd.f32 %v304_v51, %v303_v49 }
 0x228   :  { %v248_v53 = vadd.f32 %v305_v52, %v270_v50 }
 0x22a   :  { %251 = vst [vmem:[#allocation7] sm:$0xff] %v248_v53 }
 0x22b   :  { %367 = shalt.err (!%p364_p0)
}
 0x22c   :  { %261 = dma.vmem_to_hbm [thread:$0]  %s259_s10, 128, %s446_s5, [#allocation4]  }
 0x22d   :  { %380 = dma.done.wait [#allocation4], 128  }
 0x22e   :  { %381 = vsyncadd [#allocation4], 4294967168 }
 0x22f   :  { %265 = vsyncpa [#allocation3], 1 }
 0x230   :  { %266 = vsyncpa [#allocation6], 1 }
 0x231   :  { %267 = vsyncpa [#allocation4], 1 }

</bundles_post_ra>
